<compile_context>
chip_gen: v7x
topology: tpu7x:2x2x1
jax: 0.10.0
libtpu: 0.0.40
codegen_flags: <defaults>
</compile_context>

<pallas_src>
import functools

import jax
import jax.numpy as jnp
from jax.experimental import pallas as pl
from jax.experimental.pallas import tpu as pltpu

NUM_LEVELS = 16
SUBLANES = 8
LANE_TILE = 128
MAX_BLOCK_BYTES = 1 << 20          # ~1 MiB (padded-f32) per block; ~85% of HBM roofline
FAST_PATH_MIN_K = 9.0              # below this, saturation approx is not accurate enough


def _round_up(a, b):
    return ((a + b - 1) // b) * b


def _int4_fast_kernel(scale_ref, x_ref, o_ref, *, k):
    """Local-window quantizer: 4 tanh per element instead of 16.

    Levels {n0-1, n0, n0+1} (n0 = nearest interior level) and the weight-7.5
    level-16 tail are evaluated exactly; every other level is fully saturated
    (|tanh| within ~2*e^{-1.5k} of 1 for k >= 9) and enters as a +/-1 count.
    """
    scale = scale_ref[0]
    hk = 0.5 * k                                   # sigmoid(z) = 0.5 + 0.5*tanh(z/2)
    s = x_ref[...].astype(jnp.float32) * (1.0 / scale)

    n0 = jnp.clip(jnp.round(s), 1.0, 15.0)         # nearest interior level
    d = s - n0

    t_lo = jnp.tanh(hk * (d + 1.0))                # level n0-1
    t_mid = jnp.tanh(hk * d)                       # level n0
    t_hi = jnp.tanh(hk * (d - 1.0))                # level n0+1
    t_tail = jnp.tanh(hk * (s - 16.0))             # level-16 tail (weight -7.5), exact

    w_lo = jnp.where(n0 >= 2.0, 0.5, 0.0)          # level 0 does not exist
    w_hi = jnp.where(n0 <= 14.0, 0.5, 0.0)         # level 16 handled by the tail term
    n_below = jnp.maximum(n0 - 2.0, 0.0)           # saturated levels 1 .. n0-2  -> +1
    n_above = jnp.maximum(14.0 - n0, 0.0)          # saturated levels n0+2 .. 15 -> -1

    q = (0.5 * (n_below - n_above)
         + w_lo * t_lo + 0.5 * t_mid + w_hi * t_hi
         - 7.5 * t_tail)

    # out = (q - zp)*scale + zp*scale == q*scale  (zero_point cancels exactly)
    o_ref[...] = (q * scale).astype(o_ref.dtype)


def _int4_full_kernel(scale_ref, x_ref, o_ref, *, k):
    """Exact telescoped sum (16 tanh per element).  Used when k is small."""
    scale = scale_ref[0]
    hk = 0.5 * k
    t = x_ref[...].astype(jnp.float32) * (hk / scale)      # t = hk * s
    acc = jnp.tanh(t - hk)                                  # n = 1
    for n in range(2, NUM_LEVELS):
        acc = acc + jnp.tanh(t - hk * float(n))
    q = 0.5 * acc - (0.5 * (NUM_LEVELS - 1)) * jnp.tanh(t - hk * float(NUM_LEVELS))
    o_ref[...] = (q * scale).astype(o_ref.dtype)


# TODO(synk): add jax.custom_vjp with the analytic dq/ds (and d/dscale) -- pallas_call
# is not differentiable by default, so jax.grad through this forward will not work yet.
def int4_quantize(x, scale, zero_point=None, k=10.0):
    """Apply differentiable INT4 quantization elementwise.

    `zero_point` is accepted for API parity with the PyTorch module but cancels
    algebraically in the forward pass, so it never enters the kernel math.
    """
    del zero_point  # s = x/scale, out = q*scale: identical result for any zero_point

    orig_shape = x.shape
    if x.size == 0:
        return x

    # ---- 2-D logical view: collapse leading dims onto the natural last dim ---------
    # (layout-preserving collapse; no pad, no host-side dtype cast, no lane relayout)
    if x.ndim >= 2:
        lanes = x.shape[-1]
    else:
        lanes = x.size
        if lanes > 8 * 1024 and lanes % 1024 == 0:   # big 1-D: use a lane-dense view
            lanes = 1024
    rows = x.size // lanes
    x2d = x.reshape(rows, lanes)

    # ---- row blocking ---------------------------------------------------------------
    lane_pad = _round_up(lanes, LANE_TILE)           # physical lane padding in VMEM
    row_bytes = lane_pad * 4                         # budget in f32 terms
    max_rows = max(SUBLANES, (MAX_BLOCK_BYTES // row_bytes) // SUBLANES * SUBLANES)

    if rows <= max_rows:
        block_rows = rows                            # single step (no forced split)
    else:
        block_rows = max_rows
        g = pl.cdiv(rows, block_rows)
        if g % 2 == 1:                               # v7x: even grid -> both TCs busy
            block_rows = _round_up(pl.cdiv(rows, g + 1), SUBLANES)
    grid = (pl.cdiv(rows, block_rows),)

    kern = _int4_fast_kernel if float(k) >= FAST_PATH_MIN_K else _int4_full_kernel
    scale_arr = jnp.asarray(scale, dtype=jnp.float32).reshape(1)

    out2d = pl.pallas_call(
        functools.partial(kern, k=float(k)),
        out_shape=jax.ShapeDtypeStruct((rows, lanes), x.dtype),
        grid_spec=pltpu.PrefetchScalarGridSpec(
            num_scalar_prefetch=0,
            grid=grid,
            in_specs=[
                pl.BlockSpec(memory_space=pltpu.MemorySpace.SMEM),        # scale
                pl.BlockSpec((block_rows, lanes), lambda i: (i, 0)),      # x tile
            ],
            out_specs=pl.BlockSpec((block_rows, lanes), lambda i: (i, 0)),
        ),
        compiler_params=pltpu.CompilerParams(
            dimension_semantics=("parallel",),
            vmem_limit_bytes=32 * 1024 * 1024,   # safe on v5e/v6e (128 MiB) and v7x (64 MiB)
        ),
    )(scale_arr, x2d)

    return out2d.reshape(orig_shape)


def _reference(x, scale, zero_point, k=10.0):
    """Pure-JAX reference mirroring the PyTorch forward exactly (sigmoid form)."""
    s = (x - zero_point * scale) / scale + zero_point
    result = jnp.zeros_like(s)
    for n in range(NUM_LEVELS):
        if n == 0:
            term = jax.nn.sigmoid(k * s) - jax.nn.sigmoid(k * (s + 1.0))
        else:
            term = jax.nn.sigmoid(k * (s - n)) - jax.nn.sigmoid(k * (s - n - 1))
        result = result + n * term
    return (result - zero_point) * scale + zero_point * scale


if __name__ == "__main__":
    key = jax.random.PRNGKey(0)
    # Conv-style activation: batch=2, channels=4, 16x16 spatial.
    x = jax.random.normal(key, (2, 4, 16, 16), dtype=jnp.float32) * 4.0 + 6.0

    # Deterministic parameter init, matching nn.Parameter(torch.tensor(1.0)) / 0.0.
    scale = jnp.float32(1.0)
    zero_point = jnp.float32(0.0)

    out = int4_quantize(x, scale, zero_point, k=10.0)
    out = jax.block_until_ready(out)

    ref = _reference(x, scale, zero_point, k=10.0)
    assert out.shape == x.shape and out.dtype == x.dtype
    assert jnp.allclose(out, ref, atol=1e-5, rtol=1e-5)

    print("KERNEL_OK")
</pallas_src>

<mosaic_0001>
module attributes {stable_mosaic.version = 11 : i64} {
  func.func @_int4_fast_kernel(%arg0: i32, %arg1: memref<1xf32, #tpu.memory_space<smem>>, %arg2: memref<128x16xf32, #tpu.memory_space<vmem>>, %arg3: memref<128x16xf32, #tpu.memory_space<vmem>>) attributes {dimension_semantics = [#tpu.dimension_semantics<parallel>], iteration_bounds = array<i64: 1>, scalar_prefetch = 0 : i64, scratch_operands = 0 : i64, tpu.core_type = #tpu.core_type<tc>, window_params = [{transform_indices = @transform_0, window_bounds = array<i64: 1>}, {transform_indices = @transform_1, window_bounds = array<i64: 128, 16>}, {transform_indices = @transform_2, window_bounds = array<i64: 128, 16>}]} {
    %c0 = arith.constant 0 : index
    %0 = memref.load %arg1[%c0] : memref<1xf32, #tpu.memory_space<smem>>
    %c0_0 = arith.constant 0 : index
    %c0_1 = arith.constant 0 : index
    %1 = vector.load %arg2[%c0_0, %c0_1] : memref<128x16xf32, #tpu.memory_space<vmem>>, vector<128x16xf32>
    %cst = arith.constant 1.000000e+00 : f32
    %2 = arith.divf %cst, %0 : f32
    %3 = vector.broadcast %2 : f32 to vector<128x16xf32>
    %4 = arith.mulf %1, %3 : vector<128x16xf32>
    %5 = math.roundeven %4 : vector<128x16xf32>
    %cst_2 = arith.constant 1.000000e+00 : f32
    %cst_3 = arith.constant 1.500000e+01 : f32
    %6 = vector.broadcast %cst_2 : f32 to vector<128x16xf32>
    %7 = arith.maximumf %6, %5 : vector<128x16xf32>
    %8 = vector.broadcast %cst_3 : f32 to vector<128x16xf32>
    %9 = arith.minimumf %8, %7 : vector<128x16xf32>
    %10 = arith.subf %4, %9 : vector<128x16xf32>
    %cst_4 = arith.constant 1.000000e+00 : f32
    %11 = vector.broadcast %cst_4 : f32 to vector<128x16xf32>
    %12 = arith.addf %10, %11 : vector<128x16xf32>
    %cst_5 = arith.constant 5.000000e+00 : f32
    %13 = vector.broadcast %cst_5 : f32 to vector<128x16xf32>
    %14 = arith.mulf %13, %12 : vector<128x16xf32>
    %15 = math.tanh %14 : vector<128x16xf32>
    %cst_6 = arith.constant 5.000000e+00 : f32
    %16 = vector.broadcast %cst_6 : f32 to vector<128x16xf32>
    %17 = arith.mulf %16, %10 : vector<128x16xf32>
    %18 = math.tanh %17 : vector<128x16xf32>
    %cst_7 = arith.constant 1.000000e+00 : f32
    %19 = vector.broadcast %cst_7 : f32 to vector<128x16xf32>
    %20 = arith.subf %10, %19 : vector<128x16xf32>
    %cst_8 = arith.constant 5.000000e+00 : f32
    %21 = vector.broadcast %cst_8 : f32 to vector<128x16xf32>
    %22 = arith.mulf %21, %20 : vector<128x16xf32>
    %23 = math.tanh %22 : vector<128x16xf32>
    %cst_9 = arith.constant 1.600000e+01 : f32
    %24 = vector.broadcast %cst_9 : f32 to vector<128x16xf32>
    %25 = arith.subf %4, %24 : vector<128x16xf32>
    %cst_10 = arith.constant 5.000000e+00 : f32
    %26 = vector.broadcast %cst_10 : f32 to vector<128x16xf32>
    %27 = arith.mulf %26, %25 : vector<128x16xf32>
    %28 = math.tanh %27 : vector<128x16xf32>
    %cst_11 = arith.constant 2.000000e+00 : f32
    %29 = vector.broadcast %cst_11 : f32 to vector<128x16xf32>
    %30 = arith.cmpf oge, %9, %29 : vector<128x16xf32>
    %cst_12 = arith.constant 5.000000e-01 : f32
    %cst_13 = arith.constant 0.000000e+00 : f32
    %31 = vector.broadcast %cst_12 : f32 to vector<128x16xf32>
    %32 = vector.broadcast %cst_13 : f32 to vector<128x16xf32>
    %33 = arith.select %30, %31, %32 : vector<128x16xi1>, vector<128x16xf32>
    %cst_14 = arith.constant 1.400000e+01 : f32
    %34 = vector.broadcast %cst_14 : f32 to vector<128x16xf32>
    %35 = arith.cmpf ole, %9, %34 : vector<128x16xf32>
    %cst_15 = arith.constant 5.000000e-01 : f32
    %cst_16 = arith.constant 0.000000e+00 : f32
    %36 = vector.broadcast %cst_15 : f32 to vector<128x16xf32>
    %37 = vector.broadcast %cst_16 : f32 to vector<128x16xf32>
    %38 = arith.select %35, %36, %37 : vector<128x16xi1>, vector<128x16xf32>
    %cst_17 = arith.constant 2.000000e+00 : f32
    %39 = vector.broadcast %cst_17 : f32 to vector<128x16xf32>
    %40 = arith.subf %9, %39 : vector<128x16xf32>
    %cst_18 = arith.constant 0.000000e+00 : f32
    %41 = vector.broadcast %cst_18 : f32 to vector<128x16xf32>
    %42 = arith.maximumf %40, %41 : vector<128x16xf32>
    %cst_19 = arith.constant 1.400000e+01 : f32
    %43 = vector.broadcast %cst_19 : f32 to vector<128x16xf32>
    %44 = arith.subf %43, %9 : vector<128x16xf32>
    %cst_20 = arith.constant 0.000000e+00 : f32
    %45 = vector.broadcast %cst_20 : f32 to vector<128x16xf32>
    %46 = arith.maximumf %44, %45 : vector<128x16xf32>
    %47 = arith.subf %42, %46 : vector<128x16xf32>
    %cst_21 = arith.constant 5.000000e-01 : f32
    %48 = vector.broadcast %cst_21 : f32 to vector<128x16xf32>
    %49 = arith.mulf %48, %47 : vector<128x16xf32>
    %50 = arith.mulf %33, %15 : vector<128x16xf32>
    %51 = arith.addf %49, %50 : vector<128x16xf32>
    %cst_22 = arith.constant 5.000000e-01 : f32
    %52 = vector.broadcast %cst_22 : f32 to vector<128x16xf32>
    %53 = arith.mulf %52, %18 : vector<128x16xf32>
    %54 = arith.addf %51, %53 : vector<128x16xf32>
    %55 = arith.mulf %38, %23 : vector<128x16xf32>
    %56 = arith.addf %54, %55 : vector<128x16xf32>
    %cst_23 = arith.constant 7.500000e+00 : f32
    %57 = vector.broadcast %cst_23 : f32 to vector<128x16xf32>
    %58 = arith.mulf %57, %28 : vector<128x16xf32>
    %59 = arith.subf %56, %58 : vector<128x16xf32>
    %60 = vector.broadcast %0 : f32 to vector<128x16xf32>
    %61 = arith.mulf %59, %60 : vector<128x16xf32>
    %c0_24 = arith.constant 0 : index
    %c0_25 = arith.constant 0 : index
    %62 = vector.load %arg3[%c0_24, %c0_25] : memref<128x16xf32, #tpu.memory_space<vmem>>, vector<128x16xf32>
    tpu.vector_store %arg3[%c0_24, %c0_25], %61 {strides = array<i32>} : memref<128x16xf32, #tpu.memory_space<vmem>>, vector<128x16xf32>,
    return
  }
  func.func @transform_0(%arg0: i32) -> i32 {
    %c0_i32 = arith.constant 0 : i32
    %c0_i32_0 = arith.constant 0 : i32
    return %c0_i32 : i32
  }
  func.func @transform_1(%arg0: i32) -> (i32, i32) {
    %c0_i32 = arith.constant 0 : i32
    %c0_i32_0 = arith.constant 0 : i32
    return %arg0, %c0_i32 : i32, i32
  }
  func.func @transform_2(%arg0: i32) -> (i32, i32) {
    %c0_i32 = arith.constant 0 : i32
    %c0_i32_0 = arith.constant 0 : i32
    return %arg0, %c0_i32 : i32, i32
  }
}

</mosaic_0001>

<bundles_post_ra>
// kernel: tpu_custom_call.1
= control target key start
LH: loop header
LB: loop body
LE: loop exit
PB: predicated region body
PF: predicated region fallthrough
CT: control target
= control target key end

     0   :  { %s1845_s0 = inlined_call_operand.<no memory space> [shape: f32[1], index: 0, kind: input, shape index: {}]   ;;  %s1846_s1 = inlined_call_operand.vmem [shape: f32[128,16], index: 1, kind: input, shape index: {}]   ;;  %s1847_s2 = inlined_call_operand.vmem [shape: f32[128,16], index: 2, kind: output, shape index: {}]  }
   0x1   :  { %v831_v0 = vstv %s1845_s0  ;;  %v13_v2 = vld [vmem:[%s1846_s1] sm:$0xff]  ;;  %v14_v3 = vld [vmem:[%s1846_s1 + $0x8] sm:$0xff]  ;;  %v15_v4 = vld [vmem:[%s1846_s1 + $0x10] sm:$0xff] }
   0x2   :  { %1885 = vst [vmem:[#allocation3_spill] sm:$0xff] %v831_v0  ;;  %682 = vrcp.f32 %v831_v0  ;;  %v16_v5 = vld [vmem:[%s1846_s1 + $0x18] sm:$0xff]  ;;  %v17_v6 = vld [vmem:[%s1846_s1 + $0x20] sm:$0xff]  ;;  %v18_v7 = vld [vmem:[%s1846_s1 + $0x28] sm:$0xff] }
   0x3   :  { %v19_v8 = vld [vmem:[%s1846_s1 + $0x30] sm:$0xff]  ;;  %v20_v9 = vld [vmem:[%s1846_s1 + $0x38] sm:$0xff]  ;;  %v21_v10 = vld [vmem:[%s1846_s1 + $0x40] sm:$0xff] }
   0x4   :  { %v22_v11 = vld [vmem:[%s1846_s1 + $0x48] sm:$0xff]  ;;  %v23_v12 = vld [vmem:[%s1846_s1 + $0x50] sm:$0xff]  ;;  %v24_v13 = vld [vmem:[%s1846_s1 + $0x58] sm:$0xff] }
   0x5   :  { %v25_v14 = vld [vmem:[%s1846_s1 + $0x60] sm:$0xff]  ;;  %v26_v16 = vld [vmem:[%s1846_s1 + $0x68] sm:$0xff]  ;;  %v27_v17 = vld [vmem:[%s1846_s1 + $0x70] sm:$0xff] }
   0x6   :  { %v28_v18 = vld [vmem:[%s1846_s1 + $0x78] sm:$0xff] }
   0xc   :  { %v683_v1 = vpop.eup %682 }
   0xd   :  { %663 = vpush %v683_v1 }
  0x3e   :  { %s664_s30 = spop %663 }
  0x3f   :  { %v32_v15 = vstv %s664_s30 }
  0x40   :  { %v882_v19 = vmul.f32 %v32_v15, %v13_v2  ;;  %v884_v20 = vmul.f32 %v32_v15, %v14_v3  ;;  %v886_v21 = vmul.f32 %v32_v15, %v15_v4  ;;  %v888_v22 = vmul.f32 %v32_v15, %v16_v5 }
  0x41   :  { %v890_v23 = vmul.f32 %v32_v15, %v17_v6  ;;  %v892_v24 = vmul.f32 %v32_v15, %v18_v7  ;;  %v894_v25 = vmul.f32 %v32_v15, %v19_v8  ;;  %v896_v26 = vmul.f32 %v32_v15, %v20_v9 }
  0x42   :  { %v898_v27 = vmul.f32 %v32_v15, %v21_v10  ;;  %v900_v28 = vmul.f32 %v32_v15, %v22_v11  ;;  %v902_v29 = vmul.f32 %v32_v15, %v23_v12  ;;  %v904_v30 = vmul.f32 %v32_v15, %v24_v13 }
  0x43   :  { %v906_v31 = vmul.f32 %v32_v15, %v25_v14  ;;  %v908_v32 = vmul.f32 %v32_v15, %v26_v16  ;;  %v910_v33 = vmul.f32 %v32_v15, %v27_v17  ;;  %v912_v34 = vmul.f32 %v32_v15, %v28_v18 }
  0x44   :  { %v665_v35 = vround.rtne.f32 %v882_v19  ;;  %v666_v36 = vround.rtne.f32 %v884_v20  ;;  %v667_v37 = vround.rtne.f32 %v886_v21  ;;  %v668_v38 = vround.rtne.f32 %v888_v22 }
  0x45   :  { %1886 = vst [vmem:[#allocation4_spill] sm:$0xff] %v912_v34  ;;  %v669_v39 = vround.rtne.f32 %v890_v23  ;;  %v670_v40 = vround.rtne.f32 %v892_v24  ;;  %v671_v41 = vround.rtne.f32 %v894_v25  ;;  %v672_v42 = vround.rtne.f32 %v896_v26 }
  0x46   :  { %v673_v43 = vround.rtne.f32 %v898_v27  ;;  %v674_v44 = vround.rtne.f32 %v900_v28  ;;  %v675_v45 = vround.rtne.f32 %v902_v29  ;;  %v676_v46 = vround.rtne.f32 %v904_v30 }
  0x47   :  { %v677_v47 = vround.rtne.f32 %v906_v31  ;;  %v678_v48 = vround.rtne.f32 %v908_v32  ;;  %v679_v49 = vround.rtne.f32 %v910_v33  ;;  %v680_v50 = vround.rtne.f32 %v912_v34 }
  0x48   :  { %v65_v51 = vmax.f32 %v665_v35, 1.0  ;;  %v66_v52 = vmax.f32 %v666_v36, 1.0  ;;  %v67_v53 = vmax.f32 %v667_v37, 1.0  ;;  %v68_v54 = vmax.f32 %v668_v38, 1.0 }
  0x49   :  { %v69_v55 = vmax.f32 %v669_v39, 1.0  ;;  %v70_v56 = vmax.f32 %v670_v40, 1.0  ;;  %v71_v57 = vmax.f32 %v671_v41, 1.0  ;;  %v72_v58 = vmax.f32 %v672_v42, 1.0 }
  0x4a   :  { %v73_v59 = vmax.f32 %v673_v43, 1.0  ;;  %v74_v60 = vmax.f32 %v674_v44, 1.0  ;;  %v75_v61 = vmax.f32 %v675_v45, 1.0  ;;  %v76_v62 = vmax.f32 %v676_v46, 1.0 }
  0x4b   :  { %v77_v63 = vmax.f32 %v677_v47, 1.0  ;;  %v78_v1 = vmax.f32 %v678_v48, 1.0  ;;  %v79_v2 = vmax.f32 %v679_v49, 1.0  ;;  %v80_v3 = vmax.f32 %v680_v50, 1.0 }
  0x4c   :  { %v930_v4 = vmin.f32 %v65_v51, 15.0  ;;  %v932_v5 = vmin.f32 %v66_v52, 15.0  ;;  %v934_v6 = vmin.f32 %v67_v53, 15.0  ;;  %v936_v7 = vmin.f32 %v68_v54, 15.0 }
  0x4d   :  { %v938_v8 = vmin.f32 %v69_v55, 15.0  ;;  %v940_v9 = vmin.f32 %v70_v56, 15.0  ;;  %v942_v10 = vmin.f32 %v71_v57, 15.0  ;;  %v944_v11 = vmin.f32 %v72_v58, 15.0 }
  0x4e   :  { %1887 = vst [vmem:[#allocation5_spill] sm:$0xff] %v930_v4  ;;  %1888 = vst [vmem:[#allocation6_spill] sm:$0xff] %v932_v5  ;;  %v946_v12 = vmin.f32 %v73_v59, 15.0  ;;  %v948_v13 = vmin.f32 %v74_v60, 15.0  ;;  %v950_v14 = vmin.f32 %v75_v61, 15.0  ;;  %v952_v15 = vmin.f32 %v76_v62, 15.0 }
  0x4f   :  { %1889 = vst [vmem:[#allocation7_spill] sm:$0xff] %v934_v6  ;;  %1890 = vst [vmem:[#allocation8_spill] sm:$0xff] %v936_v7  ;;  %v954_v16 = vmin.f32 %v77_v63, 15.0  ;;  %v956_v17 = vmin.f32 %v78_v1, 15.0  ;;  %v958_v18 = vmin.f32 %v79_v2, 15.0  ;;  %v960_v35 = vmin.f32 %v80_v3, 15.0 }
  0x50   :  { %1891 = vst [vmem:[#allocation9_spill] sm:$0xff] %v938_v8  ;;  %1892 = vst [vmem:[#allocation10_spill] sm:$0xff] %v940_v9  ;;  %v964_v36 = vsub.f32 %v882_v19, %v930_v4  ;;  %v968_v37 = vsub.f32 %v884_v20, %v932_v5  ;;  %v972_v38 = vsub.f32 %v886_v21, %v934_v6 }
  0x51   :  { %1893 = vst [vmem:[#allocation11_spill] sm:$0xff] %v942_v10  ;;  %1894 = vst [vmem:[#allocation12_spill] sm:$0xff] %v944_v11  ;;  %v976_v39 = vsub.f32 %v888_v22, %v936_v7  ;;  %v980_v40 = vsub.f32 %v890_v23, %v938_v8  ;;  %v984_v41 = vsub.f32 %v892_v24, %v940_v9 }
  0x52   :  { %1895 = vst [vmem:[#allocation13_spill] sm:$0xff] %v946_v12  ;;  %1896 = vst [vmem:[#allocation14_spill] sm:$0xff] %v948_v13  ;;  %v988_v42 = vsub.f32 %v894_v25, %v942_v10  ;;  %v992_v43 = vsub.f32 %v896_v26, %v944_v11  ;;  %v996_v44 = vsub.f32 %v898_v27, %v946_v12  ;;  %v113_v52 = vadd.f32 1.0, %v964_v36 }
  0x53   :  { %1897 = vst [vmem:[#allocation15_spill] sm:$0xff] %v950_v14  ;;  %1898 = vst [vmem:[#allocation16_spill] sm:$0xff] %v952_v15  ;;  %v1000_v45 = vsub.f32 %v900_v28, %v948_v13  ;;  %v1004_v46 = vsub.f32 %v902_v29, %v950_v14  ;;  %v1008_v47 = vsub.f32 %v904_v30, %v952_v15  ;;  %v114_v53 = vadd.f32 1.0, %v968_v37 }
  0x54   :  { %1899 = vst [vmem:[#allocation17_spill] sm:$0xff] %v954_v16  ;;  %1900 = vst [vmem:[#allocation18_spill] sm:$0xff] %v956_v17  ;;  %v1012_v48 = vsub.f32 %v906_v31, %v954_v16  ;;  %v1016_v49 = vsub.f32 %v908_v32, %v956_v17  ;;  %v1020_v50 = vsub.f32 %v910_v33, %v958_v18  ;;  %v115_v54 = vadd.f32 1.0, %v972_v38 }
  0x55   :  { %1901 = vst [vmem:[#allocation19_spill] sm:$0xff] %v958_v18  ;;  %1902 = vst [vmem:[#allocation20_spill] sm:$0xff] %v960_v35  ;;  %v1024_v51 = vsub.f32 %v912_v34, %v960_v35  ;;  %v116_v55 = vadd.f32 1.0, %v976_v39  ;;  %v117_v56 = vadd.f32 1.0, %v980_v40  ;;  %v118_v57 = vadd.f32 1.0, %v984_v41 }
  0x56   :  { %v119_v58 = vadd.f32 1.0, %v988_v42  ;;  %v120_v59 = vadd.f32 1.0, %v992_v43  ;;  %v121_v60 = vadd.f32 1.0, %v996_v44  ;;  %v122_v61 = vadd.f32 1.0, %v1000_v45 }
  0x57   :  { %v123_v62 = vadd.f32 1.0, %v1004_v46  ;;  %v124_v63 = vadd.f32 1.0, %v1008_v47  ;;  %v125_v1 = vadd.f32 1.0, %v1012_v48  ;;  %v126_v2 = vadd.f32 1.0, %v1016_v49 }
  0x58   :  { %v127_v3 = vadd.f32 1.0, %v1020_v50  ;;  %v128_v0 = vadd.f32 1.0, %v1024_v51  ;;  %v129_v35 = vmul.f32 5.0, %v113_v52  ;;  %v130_v18 = vmul.f32 5.0, %v114_v53 }
  0x59   :  { %v131_v17 = vmul.f32 5.0, %v115_v54  ;;  %v132_v16 = vmul.f32 5.0, %v116_v55  ;;  %v133_v15 = vmul.f32 5.0, %v117_v56  ;;  %v134_v14 = vmul.f32 5.0, %v118_v57 }
  0x5a   :  { %v135_v13 = vmul.f32 5.0, %v119_v58  ;;  %v136_v12 = vmul.f32 5.0, %v120_v59  ;;  %v137_v11 = vmul.f32 5.0, %v121_v60  ;;  %v138_v10 = vmul.f32 5.0, %v122_v61 }
  0x5b   :  { %v139_v9 = vmul.f32 5.0, %v123_v62  ;;  %v140_v8 = vmul.f32 5.0, %v124_v63  ;;  %v141_v7 = vmul.f32 5.0, %v125_v1  ;;  %v142_v6 = vmul.f32 5.0, %v126_v2 }
  0x5c   :  { %v143_v5 = vmul.f32 5.0, %v127_v3  ;;  %v1042_v4 = vmul.f32 5.0, %v128_v0  ;;  %684 = vtanh.f32 %v129_v35  ;;  %v1045_v34 = vmul.f32 5.0, %v964_v36 }
  0x5d   :  { %v1048_v52 = vmul.f32 5.0, %v968_v37  ;;  %v1051_v53 = vmul.f32 5.0, %v972_v38  ;;  %686 = vtanh.f32 %v130_v18  ;;  %v1054_v54 = vmul.f32 5.0, %v976_v39 }
  0x5e   :  { %v1057_v55 = vmul.f32 5.0, %v980_v40  ;;  %v1060_v0 = vmul.f32 5.0, %v984_v41  ;;  %688 = vtanh.f32 %v131_v17  ;;  %v1063_v35 = vmul.f32 5.0, %v988_v42 }
  0x5f   :  { %v1066_v56 = vmul.f32 5.0, %v992_v43  ;;  %v1069_v57 = vmul.f32 5.0, %v996_v44  ;;  %690 = vtanh.f32 %v132_v16  ;;  %v1072_v18 = vmul.f32 5.0, %v1000_v45 }
  0x60   :  { %v1075_v58 = vmul.f32 5.0, %v1004_v46  ;;  %v1078_v59 = vmul.f32 5.0, %v1008_v47  ;;  %692 = vtanh.f32 %v133_v15  ;;  %v1081_v17 = vmul.f32 5.0, %v1012_v48 }
  0x61   :  { %v1084_v60 = vmul.f32 5.0, %v1016_v49  ;;  %v1087_v61 = vmul.f32 5.0, %v1020_v50  ;;  %694 = vtanh.f32 %v134_v14  ;;  %v1090_v16 = vmul.f32 5.0, %v1024_v51 }
  0x62   :  { %v615_v62 = vadd.f32 -1.0, %v964_v36  ;;  %v616_v63 = vadd.f32 -1.0, %v968_v37  ;;  %696 = vtanh.f32 %v135_v13  ;;  %v617_v15 = vadd.f32 -1.0, %v972_v38 }
  0x63   :  { %1903 = vst [vmem:[#allocation21_spill] sm:$0xff] %v1087_v61  ;;  %1904 = vst [vmem:[#allocation22_spill] sm:$0xff] %v1090_v16  ;;  %v618_v1 = vadd.f32 -1.0, %v976_v39  ;;  %v619_v2 = vadd.f32 -1.0, %v980_v40  ;;  %698 = vtanh.f32 %v136_v12  ;;  %v620_v3 = vadd.f32 -1.0, %v984_v41 }
  0x64   :  { %v621_v61 = vadd.f32 -1.0, %v988_v42  ;;  %v622_v14 = vadd.f32 -1.0, %v992_v43  ;;  %700 = vtanh.f32 %v137_v11  ;;  %v623_v16 = vadd.f32 -1.0, %v996_v44 }
  0x65   :  { %v624_v36 = vadd.f32 -1.0, %v1000_v45  ;;  %v625_v13 = vadd.f32 -1.0, %v1004_v46  ;;  %702 = vtanh.f32 %v138_v10  ;;  %v626_v37 = vadd.f32 -1.0, %v1008_v47 }
  0x66   :  { %v627_v38 = vadd.f32 -1.0, %v1012_v48  ;;  %v628_v12 = vadd.f32 -1.0, %v1016_v49  ;;  %v1106_v39 = vpop.eup %684  ;;  %704 = vtanh.f32 %v139_v9  ;;  %v629_v40 = vadd.f32 -1.0, %v1020_v50 }
  0x67   :  { %v630_v11 = vadd.f32 -1.0, %v1024_v51  ;;  %v1110_v41 = vmul.f32 5.0, %v615_v62  ;;  %v1112_v42 = vpop.eup %686  ;;  %706 = vtanh.f32 %v140_v8  ;;  %v1114_v43 = vmul.f32 5.0, %v616_v63 }
  0x68   :  { %v1116_v10 = vmul.f32 5.0, %v617_v15  ;;  %v1118_v44 = vmul.f32 5.0, %v618_v1  ;;  %v1120_v45 = vpop.eup %688  ;;  %708 = vtanh.f32 %v141_v7  ;;  %v1122_v46 = vmul.f32 5.0, %v619_v2 }
  0x69   :  { %v1124_v9 = vmul.f32 5.0, %v620_v3  ;;  %v1126_v47 = vmul.f32 5.0, %v621_v61  ;;  %v1128_v48 = vpop.eup %690  ;;  %710 = vtanh.f32 %v142_v6  ;;  %v1130_v49 = vmul.f32 5.0, %v622_v14 }
  0x6a   :  { %v1132_v8 = vmul.f32 5.0, %v623_v16  ;;  %v1134_v50 = vmul.f32 5.0, %v624_v36  ;;  %v1136_v51 = vpop.eup %692  ;;  %712 = vtanh.f32 %v143_v5  ;;  %v1138_v62 = vmul.f32 5.0, %v625_v13 }
  0x6b   :  { %v1140_v7 = vmul.f32 5.0, %v626_v37  ;;  %v1142_v63 = vmul.f32 5.0, %v627_v38  ;;  %v1144_v61 = vpop.eup %694  ;;  %714 = vtanh.f32 %v1042_v4  ;;  %v1147_v6 = vmul.f32 5.0, %v628_v12 }
  0x6c   :  { %v1149_v15 = vmul.f32 5.0, %v629_v40  ;;  %v1151_v16 = vmul.f32 5.0, %v630_v11  ;;  %v1153_v1 = vpop.eup %696  ;;  %716 = vtanh.f32 %v1045_v34  ;;  %v631_v5 = vadd.f32 -16.0, %v882_v19 }
  0x6d   :  { %1905 = vst [vmem:[#allocation23_spill] sm:$0xff] %v1153_v1  ;;  %v632_v2 = vadd.f32 -16.0, %v884_v20  ;;  %v633_v3 = vadd.f32 -16.0, %v886_v21  ;;  %v1159_v14 = vpop.eup %698  ;;  %718 = vtanh.f32 %v1048_v52  ;;  %v634_v4 = vadd.f32 -16.0, %v888_v22 }
  0x6e   :  { %1906 = vst [vmem:[#allocation24_spill] sm:$0xff] %v1159_v14  ;;  %v635_v36 = vadd.f32 -16.0, %v890_v23  ;;  %v636_v13 = vadd.f32 -16.0, %v892_v24  ;;  %v1165_v37 = vpop.eup %700  ;;  %720 = vtanh.f32 %v1051_v53  ;;  %v637_v19 = vadd.f32 -16.0, %v894_v25 }
  0x6f   :  { %1907 = vst [vmem:[#allocation25_spill] sm:$0xff] %v1165_v37  ;;  %v638_v20 = vadd.f32 -16.0, %v896_v26  ;;  %v639_v21 = vadd.f32 -16.0, %v898_v27  ;;  %v1171_v34 = vpop.eup %702  ;;  %722 = vtanh.f32 %v1054_v54  ;;  %v640_v22 = vadd.f32 -16.0, %v900_v28  ;;  %v1911_v54 = vld [vmem:[#allocation4_spill] sm:$0xff] }
  0x70   :  { %1908 = vst [vmem:[#allocation26_spill] sm:$0xff] %v1171_v34  ;;  %v641_v23 = vadd.f32 -16.0, %v902_v29  ;;  %v642_v24 = vadd.f32 -16.0, %v904_v30  ;;  %v1177_v52 = vpop.eup %704  ;;  %724 = vtanh.f32 %v1057_v55  ;;  %v643_v25 = vadd.f32 -16.0, %v906_v31 }
  0x71   :  { %1909 = vst [vmem:[#allocation27_spill] sm:$0xff] %v1177_v52  ;;  %v644_v26 = vadd.f32 -16.0, %v908_v32  ;;  %v645_v27 = vadd.f32 -16.0, %v910_v33  ;;  %v1183_v53 = vpop.eup %706  ;;  %726 = vtanh.f32 %v1060_v0  ;;  %v646_v28 = vadd.f32 -16.0, %v1911_v54  ;;  %v1928_v54 = vld [vmem:[#allocation13_spill] sm:$0xff] }
  0x72   :  { %1910 = vst [vmem:[#allocation28_spill] sm:$0xff] %v1183_v53  ;;  %v1187_v38 = vmul.f32 5.0, %v631_v5  ;;  %v1189_v29 = vmul.f32 5.0, %v632_v2  ;;  %v1191_v30 = vpop.eup %708  ;;  %728 = vtanh.f32 %v1063_v35  ;;  %v1194_v55 = vmul.f32 5.0, %v633_v3 }
  0x73   :  { %1912 = vst [vmem:[#allocation4_spill] sm:$0xff] %v1191_v30  ;;  %v1196_v31 = vmul.f32 5.0, %v634_v4  ;;  %v1198_v32 = vmul.f32 5.0, %v635_v36  ;;  %v1200_v33 = vpop.eup %710  ;;  %730 = vtanh.f32 %v1066_v56  ;;  %v1203_v0 = vmul.f32 5.0, %v636_v13  ;;  %v1939_v30 = vld [vmem:[#allocation20_spill] sm:$0xff] }
  0x74   :  { %1913 = vst [vmem:[#allocation29_spill] sm:$0xff] %v1200_v33  ;;  %v1205_v12 = vmul.f32 5.0, %v637_v19  ;;  %v1207_v40 = vmul.f32 5.0, %v638_v20  ;;  %v1209_v11 = vpop.eup %712  ;;  %732 = vtanh.f32 %v1069_v57  ;;  %v1212_v35 = vmul.f32 5.0, %v639_v21  ;;  %v1917_v20 = vld [vmem:[#allocation5_spill] sm:$0xff]  ;;  %v1938_v33 = vld [vmem:[#allocation19_spill] sm:$0xff] }
  0x75   :  { %1914 = vst [vmem:[#allocation30_spill] sm:$0xff] %v1209_v11  ;;  %v1214_v5 = vmul.f32 5.0, %v640_v22  ;;  %v1216_v2 = vmul.f32 5.0, %v641_v23  ;;  %v1218_v3 = vpop.eup %714  ;;  %734 = vtanh.f32 %v1072_v18  ;;  %v1221_v56 = vmul.f32 5.0, %v642_v24  ;;  %v1919_v18 = vld [vmem:[#allocation6_spill] sm:$0xff]  ;;  %v1920_v22 = vld [vmem:[#allocation7_spill] sm:$0xff] }
  0x76   :  { %1915 = vst [vmem:[#allocation31_spill] sm:$0xff] %v1218_v3  ;;  %v1223_v4 = vmul.f32 5.0, %v643_v25  ;;  %v1225_v36 = vmul.f32 5.0, %v644_v26  ;;  %v1227_v13 = vpop.eup %716  ;;  %736 = vtanh.f32 %v1075_v58  ;;  %v1230_v57 = vmul.f32 5.0, %v645_v27  ;;  %v1921_v23 = vld [vmem:[#allocation8_spill] sm:$0xff]  ;;  %v1923_v58 = vld [vmem:[#allocation9_spill] sm:$0xff] }
  0x77   :  { %1916 = vst [vmem:[#allocation32_spill] sm:$0xff] %v1227_v13  ;;  %v1232_v19 = vmul.f32 5.0, %v646_v28  ;;  %vm289_vm0 = vcmp.ge.f32.partialorder %v1917_v20, 2.0  ;;  %v1235_v21 = vpop.eup %718  ;;  %738 = vtanh.f32 %v1078_v59  ;;  %vm290_vm1 = vcmp.ge.f32.partialorder %v1919_v18, 2.0  ;;  %v1924_v25 = vld [vmem:[#allocation10_spill] sm:$0xff]  ;;  %v1925_v26 = vld [vmem:[#allocation11_spill] sm:$0xff] }
  0x78   :  { %1918 = vst [vmem:[#allocation5_spill] sm:$0xff] %v1235_v21  ;;  %vm291_vm2 = vcmp.ge.f32.partialorder %v1920_v22, 2.0  ;;  %vm292_vm3 = vcmp.ge.f32.partialorder %v1921_v23, 2.0  ;;  %v1241_v24 = vpop.eup %720  ;;  %740 = vtanh.f32 %v1081_v17  ;;  %vm293_vm4 = vcmp.ge.f32.partialorder %v1923_v58, 2.0  ;;  %v1927_v59 = vld [vmem:[#allocation12_spill] sm:$0xff]  ;;  %v1929_v28 = vld [vmem:[#allocation14_spill] sm:$0xff] }
  0x79   :  { %1922 = vst [vmem:[#allocation6_spill] sm:$0xff] %v1241_v24  ;;  %vm294_vm5 = vcmp.ge.f32.partialorder %v1924_v25, 2.0  ;;  %vm295_vm6 = vcmp.ge.f32.partialorder %v1925_v26, 2.0  ;;  %v1247_v27 = vpop.eup %722  ;;  %742 = vtanh.f32 %v1084_v60  ;;  %vm296_vm7 = vcmp.ge.f32.partialorder %v1927_v59, 2.0  ;;  %v1931_v24 = vld [vmem:[#allocation21_spill] sm:$0xff]  ;;  %v1932_v17 = vld [vmem:[#allocation15_spill] sm:$0xff] }
  0x7a   :  { %1926 = vst [vmem:[#allocation7_spill] sm:$0xff] %v1247_v27  ;;  %vm297_vm8 = vcmp.ge.f32.partialorder %v1928_v54, 2.0  ;;  %vm298_vm9 = vcmp.ge.f32.partialorder %v1929_v28, 2.0  ;;  %v1253_v21 = vpop.eup %724  ;;  %744 = vtanh.f32 %v1931_v24  ;;  %vm299_vm10 = vcmp.ge.f32.partialorder %v1932_v17, 2.0  ;;  %v1933_v13 = vld [vmem:[#allocation16_spill] sm:$0xff]  ;;  %v1934_v3 = vld [vmem:[#allocation17_spill] sm:$0xff] }
  0x7b   :  { %1930 = vst [vmem:[#allocation8_spill] sm:$0xff] %v1253_v21  ;;  %vm300_vm11 = vcmp.ge.f32.partialorder %v1933_v13, 2.0  ;;  %vm301_vm12 = vcmp.ge.f32.partialorder %v1934_v3, 2.0  ;;  %v1259_v11 = vpop.eup %726  ;;  %v1936_v27 = vld [vmem:[#allocation22_spill] sm:$0xff]  ;;  %vm303_vm14 = vcmp.ge.f32.partialorder %v1938_v33, 2.0  ;;  %vm304_vm15 = vcmp.ge.f32.partialorder %v1939_v30, 2.0 }
  0x7c   :  { %1935 = vst [vmem:[#allocation9_spill] sm:$0xff] %v1259_v11  ;;  %746 = vtanh.f32 %v1936_v27  ;;  %v1937_v60 = vld [vmem:[#allocation18_spill] sm:$0xff]  ;;  %v1265_v53 = vpop.eup %728  ;;  %v1883_v24 = vmov 0.0  }
  0x7d   :  { %vm302_vm13 = vcmp.ge.f32.partialorder %v1937_v60, 2.0  ;;  %1940 = vst [vmem:[#allocation10_spill] sm:$0xff] %v1265_v53  ;;  %748 = vtanh.f32 %v1110_v41  ;;  %v1271_v21 = vsel %vm289_vm0, 0.5, %v1883_v24  ;;  %v1276_v27 = vsel %vm290_vm1, 0.5, %v1883_v24  ;;  %v1283_v52 = vpop.eup %730 }
  0x7e   :  { %v1281_v11 = vsel %vm291_vm2, 0.5, %v1883_v24  ;;  %1941 = vst [vmem:[#allocation11_spill] sm:$0xff] %v1283_v52  ;;  %750 = vtanh.f32 %v1114_v43  ;;  %v1289_v41 = vsel %vm292_vm3, 0.5, %v1883_v24  ;;  %v1294_v53 = vsel %vm293_vm4, 0.5, %v1883_v24  ;;  %v1301_v37 = vpop.eup %732 }
  0x7f   :  { %v1299_v34 = vsel %vm294_vm5, 0.5, %v1883_v24  ;;  %1942 = vst [vmem:[#allocation12_spill] sm:$0xff] %v1301_v37  ;;  %752 = vtanh.f32 %v1116_v10  ;;  %v1307_v43 = vsel %vm295_vm6, 0.5, %v1883_v24  ;;  %v1312_v52 = vsel %vm296_vm7, 0.5, %v1883_v24  ;;  %v1319_v1 = vpop.eup %734 }
  0x80   :  { %1943 = vst [vmem:[#allocation13_spill] sm:$0xff] %v1312_v52  ;;  %v1317_v14 = vsel %vm297_vm8, 0.5, %v1883_v24  ;;  %1945 = vst [vmem:[#allocation21_spill] sm:$0xff] %v1319_v1  ;;  %754 = vtanh.f32 %v1118_v44  ;;  %v1325_v10 = vsel %vm298_vm9, 0.5, %v1883_v24  ;;  %v1330_v37 = vsel %vm299_vm10, 0.5, %v1883_v24 }
  0x81   :  { %1944 = vst [vmem:[#allocation14_spill] sm:$0xff] %v1317_v14  ;;  %1946 = vst [vmem:[#allocation15_spill] sm:$0xff] %v1325_v10  ;;  %v1335_v52 = vsel %vm300_vm11, 0.5, %v1883_v24  ;;  %v1337_v14 = vpop.eup %736  ;;  %756 = vtanh.f32 %v1122_v46  ;;  %v1343_v44 = vsel %vm301_vm12, 0.5, %v1883_v24  ;;  %v1348_v1 = vsel %vm302_vm13, 0.5, %v1883_v24 }
  0x82   :  { %1947 = vst [vmem:[#allocation16_spill] sm:$0xff] %v1330_v37  ;;  %1948 = vst [vmem:[#allocation17_spill] sm:$0xff] %v1335_v52  ;;  %v1353_v37 = vsel %vm303_vm14, 0.5, %v1883_v24  ;;  %v1355_v52 = vpop.eup %738  ;;  %758 = vtanh.f32 %v1124_v9  ;;  %v1361_v46 = vsel %vm304_vm15, 0.5, %v1883_v24  ;;  %vm321_vm0 = vcmp.le.f32.partialorder %v1917_v20, 14.0 }
  0x83   :  { %1949 = vst [vmem:[#allocation22_spill] sm:$0xff] %v1337_v14  ;;  %1950 = vst [vmem:[#allocation18_spill] sm:$0xff] %v1343_v44  ;;  %vm322_vm1 = vcmp.le.f32.partialorder %v1919_v18, 14.0  ;;  %v1365_v14 = vpop.eup %740  ;;  %760 = vtanh.f32 %v1126_v47  ;;  %vm323_vm2 = vcmp.le.f32.partialorder %v1920_v22, 14.0  ;;  %vm324_vm3 = vcmp.le.f32.partialorder %v1921_v23, 14.0 }
  0x84   :  { %1951 = vst [vmem:[#allocation19_spill] sm:$0xff] %v1348_v1  ;;  %1952 = vst [vmem:[#allocation20_spill] sm:$0xff] %v1353_v37  ;;  %vm325_vm4 = vcmp.le.f32.partialorder %v1923_v58, 14.0  ;;  %v1371_v9 = vpop.eup %742  ;;  %762 = vtanh.f32 %v1130_v49  ;;  %vm326_vm5 = vcmp.le.f32.partialorder %v1924_v25, 14.0  ;;  %vm327_vm6 = vcmp.le.f32.partialorder %v1925_v26, 14.0 }
  0x85   :  { %1953 = vst [vmem:[#allocation33_spill] sm:$0xff] %v1355_v52  ;;  %1954 = vst [vmem:[#allocation34_spill] sm:$0xff] %v1361_v46  ;;  %vm328_vm7 = vcmp.le.f32.partialorder %v1927_v59, 14.0  ;;  %v1377_v24 = vpop.eup %744  ;;  %764 = vtanh.f32 %v1132_v8  ;;  %vm329_vm8 = vcmp.le.f32.partialorder %v1928_v54, 14.0  ;;  %vm330_vm9 = vcmp.le.f32.partialorder %v1929_v28, 14.0 }
  0x86   :  { %1955 = vst [vmem:[#allocation35_spill] sm:$0xff] %v1365_v14  ;;  %1956 = vst [vmem:[#allocation36_spill] sm:$0xff] %v1371_v9  ;;  %vm331_vm10 = vcmp.le.f32.partialorder %v1932_v17, 14.0  ;;  %v1383_v47 = vpop.eup %746  ;;  %766 = vtanh.f32 %v1134_v50  ;;  %vm332_vm11 = vcmp.le.f32.partialorder %v1933_v13, 14.0  ;;  %vm333_vm12 = vcmp.le.f32.partialorder %v1934_v3, 14.0 }
  0x87   :  { %1957 = vst [vmem:[#allocation37_spill] sm:$0xff] %v1377_v24  ;;  %1958 = vst [vmem:[#allocation38_spill] sm:$0xff] %v1383_v47  ;;  %vm334_vm13 = vcmp.le.f32.partialorder %v1937_v60, 14.0  ;;  %v1389_v49 = vpop.eup %748  ;;  %768 = vtanh.f32 %v1138_v62  ;;  %vm335_vm14 = vcmp.le.f32.partialorder %v1938_v33, 14.0  ;;  %vm336_vm15 = vcmp.le.f32.partialorder %v1939_v30, 14.0 }
  0x88   :  { %1959 = vst [vmem:[#allocation39_spill] sm:$0xff] %v1389_v49  ;;  %v1960_v8 = vmov 0.0   ;;  %v1399_v50 = vpop.eup %750  ;;  %770 = vtanh.f32 %v1140_v7  ;;  %v1541_v9 = vadd.f32 -2.0, %v1934_v3  ;;  %v1553_v52 = vadd.f32 -2.0, %v1939_v30 }
  0x89   :  { %v1397_v47 = vsel %vm321_vm0, 0.5, %v1960_v8  ;;  %1962 = vst [vmem:[#allocation41_spill] sm:$0xff] %v1399_v50  ;;  %v1405_v24 = vsel %vm322_vm1, 0.5, %v1960_v8  ;;  %v1410_v62 = vsel %vm323_vm2, 0.5, %v1960_v8  ;;  %v1415_v49 = vsel %vm324_vm3, 0.5, %v1960_v8 }
  0x8a   :  { %1961 = vst [vmem:[#allocation40_spill] sm:$0xff] %v1397_v47  ;;  %1963 = vst [vmem:[#allocation42_spill] sm:$0xff] %v1405_v24  ;;  %v1417_v47 = vpop.eup %752  ;;  %772 = vtanh.f32 %v1142_v63  ;;  %v1423_v7 = vsel %vm325_vm4, 0.5, %v1960_v8  ;;  %v1428_v50 = vsel %vm326_vm5, 0.5, %v1960_v8  ;;  %v1441_v63 = vsel %vm328_vm7, 0.5, %v1960_v8 }
  0x8b   :  { %1964 = vst [vmem:[#allocation43_spill] sm:$0xff] %v1410_v62  ;;  %1965 = vst [vmem:[#allocation44_spill] sm:$0xff] %v1415_v49  ;;  %v1433_v62 = vsel %vm327_vm6, 0.5, %v1960_v8  ;;  %v1435_v49 = vpop.eup %754  ;;  %774 = vtanh.f32 %v1147_v6  ;;  %v1459_v6 = vsel %vm331_vm10, 0.5, %v1960_v8  ;;  %v385_v44 = vsub.f32 14.0, %v1917_v20 }
  0x8c   :  { %1966 = vst [vmem:[#allocation45_spill] sm:$0xff] %v1417_v47  ;;  %1967 = vst [vmem:[#allocation46_spill] sm:$0xff] %v1423_v7  ;;  %v1446_v7 = vsel %vm329_vm8, 0.5, %v1960_v8  ;;  %776 = vtanh.f32 %v1149_v15  ;;  %v1477_v15 = vsel %vm334_vm13, 0.5, %v1960_v8  ;;  %v1529_v47 = vadd.f32 -2.0, %v1929_v28 }
  0x8d   :  { %1968 = vst [vmem:[#allocation47_spill] sm:$0xff] %v1428_v50  ;;  %1969 = vst [vmem:[#allocation48_spill] sm:$0xff] %v1433_v62  ;;  %v1451_v50 = vsel %vm330_vm9, 0.5, %v1960_v8  ;;  %v1453_v62 = vpop.eup %756  ;;  %778 = vtanh.f32 %v1151_v16  ;;  %v1493_v16 = vadd.f32 -2.0, %v1917_v20  ;;  %v390_v1 = vsub.f32 14.0, %v1924_v25 }
  0x8e   :  { %1970 = vst [vmem:[#allocation49_spill] sm:$0xff] %v1435_v49  ;;  %1971 = vst [vmem:[#allocation50_spill] sm:$0xff] %v1441_v63  ;;  %v1464_v63 = vsel %vm332_vm11, 0.5, %v1960_v8  ;;  %780 = vtanh.f32 %v1187_v38  ;;  %v1511_v38 = vadd.f32 -2.0, %v1924_v25  ;;  %v391_v20 = vsub.f32 14.0, %v1925_v26 }
  0x8f   :  { %1972 = vst [vmem:[#allocation51_spill] sm:$0xff] %v1446_v7  ;;  %1973 = vst [vmem:[#allocation52_spill] sm:$0xff] %v1451_v50  ;;  %v1469_v7 = vsel %vm333_vm12, 0.5, %v1960_v8  ;;  %v1471_v50 = vpop.eup %758  ;;  %782 = vtanh.f32 %v1189_v29  ;;  %v1523_v29 = vadd.f32 -2.0, %v1928_v54  ;;  %v397_v25 = vsub.f32 14.0, %v1934_v3 }
  0x90   :  { %1974 = vst [vmem:[#allocation53_spill] sm:$0xff] %v1453_v62  ;;  %1975 = vst [vmem:[#allocation54_spill] sm:$0xff] %v1459_v6  ;;  %v1482_v6 = vsel %vm335_vm14, 0.5, %v1960_v8  ;;  %784 = vtanh.f32 %v1194_v55  ;;  %v1535_v55 = vadd.f32 -2.0, %v1933_v13  ;;  %v406_v3 = vmax.f32 %v390_v1, 0.0 }
  0x91   :  { %1976 = vst [vmem:[#allocation55_spill] sm:$0xff] %v1464_v63  ;;  %1977 = vst [vmem:[#allocation56_spill] sm:$0xff] %v1469_v7  ;;  %v1487_v63 = vsel %vm336_vm15, 0.5, %v1960_v8  ;;  %v1489_v7 = vpop.eup %760  ;;  %v1505_v8 = vadd.f32 -2.0, %v1921_v23  ;;  %786 = vtanh.f32 %v1196_v31  ;;  %v1547_v31 = vadd.f32 -2.0, %v1938_v33 }
  0x92   :  { %1978 = vst [vmem:[#allocation57_spill] sm:$0xff] %v1471_v50  ;;  %1979 = vst [vmem:[#allocation58_spill] sm:$0xff] %v1477_v15  ;;  %v1496_v50 = vadd.f32 -2.0, %v1919_v18  ;;  %v1499_v15 = vadd.f32 -2.0, %v1920_v22  ;;  %v1501_v62 = vpop.eup %762  ;;  %788 = vtanh.f32 %v1198_v32  ;;  %v388_v32 = vsub.f32 14.0, %v1921_v23 }
  0x93   :  { %1980 = vst [vmem:[#allocation59_spill] sm:$0xff] %v1482_v6  ;;  %1981 = vst [vmem:[#allocation60_spill] sm:$0xff] %v1487_v63  ;;  %v1508_v63 = vadd.f32 -2.0, %v1923_v58  ;;  %v1513_v6 = vpop.eup %764  ;;  %790 = vtanh.f32 %v1203_v0  ;;  %vm594_vm0 = vcmask 130048  }
  0x94   :  { %1982 = vst [vmem:[#allocation61_spill] sm:$0xff] %v1489_v7  ;;  %1983 = vst [vmem:[#allocation62_spill] sm:$0xff] %v1501_v62  ;;  %v1517_v7 = vadd.f32 -2.0, %v1925_v26  ;;  %v1520_v62 = vadd.f32 -2.0, %v1927_v59  ;;  %v1525_v49 = vpop.eup %766  ;;  %792 = vtanh.f32 %v1205_v12  ;;  %v1998_v1 = vmax.f32 %v1496_v50, 0.0 }
  0x95   :  { %1984 = vst [vmem:[#allocation63_spill] sm:$0xff] %v1513_v6  ;;  %1985 = vst [vmem:[#allocation64_spill] sm:$0xff] %v1525_v49  ;;  %v1532_v6 = vadd.f32 -2.0, %v1932_v17  ;;  %v1537_v24 = vpop.eup %768  ;;  %v1544_v49 = vadd.f32 -2.0, %v1937_v60  ;;  %794 = vtanh.f32 %v1207_v40 }
  0x96   :  { %1986 = vst [vmem:[#allocation65_spill] sm:$0xff] %v1537_v24  ;;  %v1549_v14 = vpop.eup %770  ;;  %796 = vtanh.f32 %v1212_v35  ;;  %v387_v24 = vsub.f32 14.0, %v1920_v22  ;;  %v394_v22 = vsub.f32 14.0, %v1929_v28  ;;  %v2004_v50 = vmax.f32 %v1520_v62, 0.0 }
  0x97   :  { %1987 = vst [vmem:[#allocation66_spill] sm:$0xff] %v1549_v14  ;;  %v1557_v46 = vpop.eup %772  ;;  %798 = vtanh.f32 %v1214_v5  ;;  %v386_v5 = vsub.f32 14.0, %v1919_v18  ;;  %v393_v18 = vsub.f32 14.0, %v1928_v54  ;;  %v400_v54 = vsub.f32 14.0, %v1939_v30 }
  0x98   :  { %v1563_v14 = vpop.eup %774  ;;  %800 = vtanh.f32 %v1216_v2  ;;  %v389_v2 = vsub.f32 14.0, %v1923_v58  ;;  %v396_v58 = vsub.f32 14.0, %v1933_v13  ;;  %v413_v30 = vmax.f32 %v397_v25, 0.0 }
  0x99   :  { %v1569_v10 = vpop.eup %776  ;;  %802 = vtanh.f32 %v1221_v56  ;;  %v392_v56 = vsub.f32 14.0, %v1927_v59  ;;  %v399_v59 = vsub.f32 14.0, %v1938_v33  ;;  %v2001_v25 = vmax.f32 %v1508_v63, 0.0 }
  0x9a   :  { %1988 = vst [vmem:[#allocation67_spill] sm:$0xff] %v1569_v10  ;;  %v1575_v37 = vpop.eup %778  ;;  %804 = vtanh.f32 %v1223_v4  ;;  %v395_v4 = vsub.f32 14.0, %v1932_v17  ;;  %v404_v17 = vmax.f32 %v388_v32, 0.0  ;;  %v405_v13 = vmax.f32 %v389_v2, 0.0 }
  0x9b   :  { %1989 = vst [vmem:[#allocation68_spill] sm:$0xff] %v1575_v37  ;;  %v1581_v0 = vpop.eup %780  ;;  %806 = vtanh.f32 %v1225_v36  ;;  %v398_v36 = vsub.f32 14.0, %v1937_v60  ;;  %v410_v60 = vmax.f32 %v394_v22, 0.0  ;;  %v412_v33 = vmax.f32 %v396_v58, 0.0 }
  0x9c   :  { %1990 = vst [vmem:[#allocation69_spill] sm:$0xff] %v1581_v0  ;;  %v1587_v12 = vpop.eup %782  ;;  %808 = vtanh.f32 %v1230_v57  ;;  %v402_v57 = vmax.f32 %v386_v5, 0.0  ;;  %v411_v37 = vmax.f32 %v395_v4, 0.0  ;;  %v416_v5 = vmax.f32 %v400_v54, 0.0 }
  0x9d   :  { %1991 = vst [vmem:[#allocation70_spill] sm:$0xff] %v1587_v12  ;;  %v1593_v40 = vpop.eup %784  ;;  %810 = vtanh.f32 %v1232_v19  ;;  %v407_v12 = vmax.f32 %v391_v20, 0.0  ;;  %v409_v19 = vmax.f32 %v393_v18, 0.0  ;;  %v1997_v32 = vmax.f32 %v1493_v16, 0.0 }
  0x9e   :  { %1992 = vst [vmem:[#allocation71_spill] sm:$0xff] %v1593_v40  ;;  %v1599_v35 = vpop.eup %786  ;;  %v418_v20 = vsub.f32 %v1998_v1, %v402_v57  ;;  %v2000_v22 = vmax.f32 %v1505_v8, 0.0  ;;  %v2003_v16 = vmax.f32 %v1517_v7, 0.0  ;;  %v2007_v63 = vmax.f32 %v1532_v6, 0.0 }
  0x9f   :  { %1993 = vst [vmem:[#allocation72_spill] sm:$0xff] %v1599_v35  ;;  %v1605_v23 = vpop.eup %788  ;;  %v403_v35 = vmax.f32 %v387_v24, 0.0  ;;  %v2009_v7 = vmax.f32 %v1541_v9, 0.0 }
  0xa0   :  { %1994 = vst [vmem:[#allocation73_spill] sm:$0xff] %v1605_v23  ;;  %v1611_v26 = vpop.eup %790  ;;  %v401_v23 = vmax.f32 %v385_v44, 0.0  ;;  %v415_v44 = vmax.f32 %v399_v59, 0.0  ;;  %v420_v4 = vsub.f32 %v2000_v22, %v404_v17  ;;  %v2002_v59 = vmax.f32 %v1511_v38, 0.0 }
  0xa1   :  { %1995 = vst [vmem:[#allocation74_spill] sm:$0xff] %v1611_v26  ;;  %v1617_v28 = vpop.eup %792  ;;  %v408_v26 = vmax.f32 %v392_v56, 0.0  ;;  %v1999_v56 = vmax.f32 %v1499_v15, 0.0  ;;  %v2005_v15 = vmax.f32 %v1523_v29, 0.0  ;;  %v2008_v38 = vmax.f32 %v1535_v55, 0.0 }
  0xa2   :  { %1996 = vst [vmem:[#allocation75_spill] sm:$0xff] %v1617_v28  ;;  %v1619_v40 = vpop.eup %794  ;;  %v414_v28 = vmax.f32 %v398_v36, 0.0  ;;  %v417_v2 = vsub.f32 %v1997_v32, %v401_v23  ;;  %v421_v36 = vsub.f32 %v2001_v25, %v405_v13  ;;  %v422_v54 = vsub.f32 %v2002_v59, %v406_v3 }
  0xa3   :  { %v1621_v0 = vpop.eup %796  ;;  %v419_v18 = vsub.f32 %v1999_v56, %v403_v35  ;;  %v423_v23 = vsub.f32 %v2003_v16, %v407_v12  ;;  %v424_v57 = vsub.f32 %v2004_v50, %v408_v26  ;;  %v425_v8 = vsub.f32 %v2005_v15, %v409_v19  ;;  %v2014_v15 = vld [vmem:[#allocation13_spill] sm:$0xff] }
  0xa4   :  { %v1623_v10 = vpop.eup %798  ;;  %v2006_v35 = vmax.f32 %v1529_v47, 0.0  ;;  %v427_v13 = vsub.f32 %v2007_v63, %v411_v37  ;;  %v428_v3 = vsub.f32 %v2008_v38, %v412_v33  ;;  %v429_v62 = vsub.f32 %v2009_v7, %v413_v30  ;;  %v2022_v63 = vld [vmem:[#allocation17_spill] sm:$0xff]  ;;  %v2026_v38 = vld [vmem:[#allocation19_spill] sm:$0xff]  ;;  %v2028_v7 = vld [vmem:[#allocation20_spill] sm:$0xff] }
  0xa5   :  { %v1625_v24 = vpop.eup %800  ;;  %v2010_v12 = vmax.f32 %v1544_v49, 0.0  ;;  %v2011_v29 = vmax.f32 %v1547_v31, 0.0  ;;  %v2012_v47 = vmax.f32 %v1553_v52, 0.0  ;;  %v433_v37 = vmul.f32 0.5, %v417_v2 }
  0xa6   :  { %v1635_v58 = vpop.eup %802  ;;  %v426_v17 = vsub.f32 %v2006_v35, %v410_v60  ;;  %v434_v6 = vmul.f32 0.5, %v418_v20  ;;  %v435_v55 = vmul.f32 0.5, %v419_v18  ;;  %v436_v33 = vmul.f32 0.5, %v420_v4  ;;  %v2018_v35 = vld [vmem:[#allocation15_spill] sm:$0xff] }
  0xa7   :  { %v1645_v32 = vpop.eup %804  ;;  %v430_v26 = vsub.f32 %v2010_v12, %v414_v28  ;;  %v431_v19 = vsub.f32 %v2011_v29, %v415_v44  ;;  %v432_v60 = vsub.f32 %v2012_v47, %v416_v5  ;;  %v437_v25 = vmul.f32 0.5, %v421_v36  ;;  %v2031_v29 = vld [vmem:[#allocation31_spill] sm:$0xff] }
  0xa8   :  { %v1655_v1 = vpop.eup %806  ;;  %v438_v9 = vmul.f32 0.5, %v422_v54  ;;  %v439_v30 = vmul.f32 0.5, %v423_v23  ;;  %v440_v59 = vmul.f32 0.5, %v424_v57  ;;  %v441_v49 = vmul.f32 0.5, %v425_v8  ;;  %v2013_v23 = vld [vmem:[#allocation23_spill] sm:$0xff]  ;;  %v2016_v8 = vld [vmem:[#allocation14_spill] sm:$0xff] }
  0xa9   :  { %v1665_v56 = vpop.eup %808  ;;  %v442_v28 = vmul.f32 0.5, %v426_v17  ;;  %v443_v16 = vmul.f32 0.5, %v427_v13  ;;  %v444_v31 = vmul.f32 0.5, %v428_v3  ;;  %v445_v44 = vmul.f32 0.5, %v429_v62  ;;  %v2020_v17 = vld [vmem:[#allocation16_spill] sm:$0xff]  ;;  %v2024_v13 = vld [vmem:[#allocation18_spill] sm:$0xff] }
  0xaa   :  { %v1667_v22 = vpop.eup %810  ;;  %v446_v50 = vmul.f32 0.5, %v430_v26  ;;  %v447_v52 = vmul.f32 0.5, %v431_v19  ;;  %v448_v5 = vmul.f32 0.5, %v432_v60  ;;  %v449_v2 = vmul.f32 %v1106_v39, %v1271_v21  ;;  %v2015_v39 = vld [vmem:[#allocation24_spill] sm:$0xff]  ;;  %v2029_v62 = vld [vmem:[#allocation30_spill] sm:$0xff] }
  0xab   :  { %v450_v20 = vmul.f32 %v1112_v42, %v1276_v27  ;;  %v451_v18 = vmul.f32 %v1120_v45, %v1281_v11  ;;  %v452_v4 = vmul.f32 %v1128_v48, %v1289_v41  ;;  %v453_v36 = vmul.f32 %v1136_v51, %v1294_v53  ;;  %v2017_v42 = vld [vmem:[#allocation25_spill] sm:$0xff]  ;;  %v2019_v45 = vld [vmem:[#allocation26_spill] sm:$0xff]  ;;  %v2021_v48 = vld [vmem:[#allocation27_spill] sm:$0xff] }
  0xac   :  { %v454_v54 = vmul.f32 %v1144_v61, %v1299_v34  ;;  %v455_v57 = vmul.f32 %v2013_v23, %v1307_v43  ;;  %v456_v21 = vmul.f32 %v2015_v39, %v2014_v15  ;;  %v457_v27 = vmul.f32 %v2017_v42, %v2016_v8  ;;  %v2023_v51 = vld [vmem:[#allocation28_spill] sm:$0xff]  ;;  %v2027_v43 = vld [vmem:[#allocation29_spill] sm:$0xff]  ;;  %v2030_v26 = vld [vmem:[#allocation34_spill] sm:$0xff] }
  0xad   :  { %v458_v11 = vmul.f32 %v2019_v45, %v2018_v35  ;;  %v459_v41 = vmul.f32 %v2021_v48, %v2020_v17  ;;  %v460_v53 = vmul.f32 %v2023_v51, %v2022_v63  ;;  %v2025_v61 = vld [vmem:[#allocation4_spill] sm:$0xff]  ;;  %v462_v3 = vmul.f32 %v2027_v43, %v2026_v38 }
  0xae   :  { %v461_v34 = vmul.f32 %v2025_v61, %v2024_v13  ;;  %v463_v12 = vmul.f32 %v2029_v62, %v2028_v7  ;;  %v464_v19 = vmul.f32 %v2031_v29, %v2030_v26  ;;  %v465_v47 = vadd.f32 %v449_v2, %v433_v37  ;;  %v2032_v43 = vld [vmem:[#allocation32_spill] sm:$0xff]  ;;  %v2033_v62 = vld [vmem:[#allocation5_spill] sm:$0xff]  ;;  %v2034_v37 = vld [vmem:[#allocation6_spill] sm:$0xff] }
  0xaf   :  { %v466_v60 = vadd.f32 %v450_v20, %v434_v6  ;;  %v467_v23 = vadd.f32 %v451_v18, %v435_v55  ;;  %v468_v15 = vadd.f32 %v452_v4, %v436_v33  ;;  %v469_v39 = vadd.f32 %v453_v36, %v437_v25  ;;  %v2035_v55 = vld [vmem:[#allocation7_spill] sm:$0xff]  ;;  %v2036_v25 = vld [vmem:[#allocation8_spill] sm:$0xff]  ;;  %v2042_v2 = vld [vmem:[#allocation22_spill] sm:$0xff] }
  0xb0   :  { %v470_v8 = vadd.f32 %v454_v54, %v438_v9  ;;  %v471_v42 = vadd.f32 %v455_v57, %v439_v30  ;;  %v472_v35 = vadd.f32 %v456_v21, %v440_v59  ;;  %v473_v45 = vadd.f32 %v457_v27, %v441_v49  ;;  %v2037_v30 = vld [vmem:[#allocation9_spill] sm:$0xff]  ;;  %v2038_v49 = vld [vmem:[#allocation10_spill] sm:$0xff]  ;;  %v2044_v36 = vld [vmem:[#allocation35_spill] sm:$0xff] }
  0xb1   :  { %v474_v17 = vadd.f32 %v458_v11, %v442_v28  ;;  %v475_v48 = vadd.f32 %v459_v41, %v443_v16  ;;  %v476_v63 = vadd.f32 %v460_v53, %v444_v31  ;;  %v477_v51 = vadd.f32 %v461_v34, %v445_v44  ;;  %v2039_v16 = vld [vmem:[#allocation11_spill] sm:$0xff]  ;;  %v2040_v44 = vld [vmem:[#allocation12_spill] sm:$0xff]  ;;  %v2043_v18 = vld [vmem:[#allocation33_spill] sm:$0xff] }
  0xb2   :  { %v478_v13 = vadd.f32 %v462_v3, %v446_v50  ;;  %v479_v61 = vadd.f32 %v463_v12, %v447_v52  ;;  %v480_v38 = vadd.f32 %v464_v19, %v448_v5  ;;  %v481_v7 = vmul.f32 0.5, %v2032_v43  ;;  %v2041_v52 = vld [vmem:[#allocation21_spill] sm:$0xff]  ;;  %v2045_v57 = vld [vmem:[#allocation36_spill] sm:$0xff]  ;;  %v2047_v41 = vld [vmem:[#allocation38_spill] sm:$0xff] }
  0xb3   :  { %v482_v26 = vmul.f32 0.5, %v2033_v62  ;;  %v483_v6 = vmul.f32 0.5, %v2034_v37  ;;  %v484_v33 = vmul.f32 0.5, %v2035_v55  ;;  %v485_v9 = vmul.f32 0.5, %v2036_v25  ;;  %v2046_v27 = vld [vmem:[#allocation37_spill] sm:$0xff] }
  0xb4   :  { %v486_v59 = vmul.f32 0.5, %v2037_v30  ;;  %v487_v28 = vmul.f32 0.5, %v2038_v49  ;;  %v488_v31 = vmul.f32 0.5, %v2039_v16  ;;  %v489_v50 = vmul.f32 0.5, %v2040_v44 }
  0xb5   :  { %v490_v5 = vmul.f32 0.5, %v2041_v52  ;;  %v491_v20 = vmul.f32 0.5, %v2042_v2  ;;  %v492_v4 = vmul.f32 0.5, %v2043_v18  ;;  %v493_v54 = vmul.f32 0.5, %v2044_v36  ;;  %v2048_v18 = vld [vmem:[#allocation40_spill] sm:$0xff]  ;;  %v2049_v36 = vld [vmem:[#allocation39_spill] sm:$0xff] }
  0xb6   :  { %v494_v21 = vmul.f32 0.5, %v2045_v57  ;;  %v495_v11 = vmul.f32 0.5, %v2046_v27  ;;  %v496_v53 = vmul.f32 0.5, %v2047_v41  ;;  %v497_v34 = vadd.f32 %v481_v7, %v465_v47  ;;  %v2050_v27 = vld [vmem:[#allocation42_spill] sm:$0xff]  ;;  %v2051_v47 = vld [vmem:[#allocation41_spill] sm:$0xff] }
  0xb7   :  { %v498_v3 = vadd.f32 %v482_v26, %v466_v60  ;;  %v499_v12 = vadd.f32 %v483_v6, %v467_v23  ;;  %v500_v29 = vadd.f32 %v484_v33, %v468_v15  ;;  %v501_v19 = vadd.f32 %v485_v9, %v469_v39  ;;  %v2052_v23 = vld [vmem:[#allocation43_spill] sm:$0xff]  ;;  %v2053_v15 = vld [vmem:[#allocation45_spill] sm:$0xff]  ;;  %v2062_v26 = vld [vmem:[#allocation50_spill] sm:$0xff] }
  0xb8   :  { %v502_v43 = vadd.f32 %v486_v59, %v470_v8  ;;  %v503_v62 = vadd.f32 %v487_v28, %v471_v42  ;;  %v504_v37 = vadd.f32 %v488_v31, %v472_v35  ;;  %v505_v55 = vadd.f32 %v489_v50, %v473_v45  ;;  %v2054_v8 = vld [vmem:[#allocation44_spill] sm:$0xff]  ;;  %v2055_v42 = vld [vmem:[#allocation49_spill] sm:$0xff]  ;;  %v2056_v45 = vld [vmem:[#allocation46_spill] sm:$0xff] }
  0xb9   :  { %v506_v25 = vadd.f32 %v490_v5, %v474_v17  ;;  %v507_v30 = vadd.f32 %v491_v20, %v475_v48  ;;  %v508_v49 = vadd.f32 %v492_v4, %v476_v63  ;;  %v509_v16 = vadd.f32 %v493_v54, %v477_v51  ;;  %v2057_v17 = vld [vmem:[#allocation53_spill] sm:$0xff]  ;;  %v2058_v63 = vld [vmem:[#allocation47_spill] sm:$0xff]  ;;  %v2063_v6 = vld [vmem:[#allocation62_spill] sm:$0xff] }
  0xba   :  { %v510_v44 = vadd.f32 %v494_v21, %v478_v13  ;;  %v511_v52 = vadd.f32 %v495_v11, %v479_v61  ;;  %v512_v2 = vadd.f32 %v496_v53, %v480_v38  ;;  %v513_v57 = vmul.f32 %v2049_v36, %v2048_v18  ;;  %v2059_v51 = vld [vmem:[#allocation57_spill] sm:$0xff]  ;;  %v2060_v61 = vld [vmem:[#allocation48_spill] sm:$0xff]  ;;  %v2064_v9 = vld [vmem:[#allocation51_spill] sm:$0xff] }
  0xbb   :  { %v514_v60 = vmul.f32 %v2051_v47, %v2050_v27  ;;  %v515_v39 = vmul.f32 %v2053_v15, %v2052_v23  ;;  %v516_v35 = vmul.f32 %v2055_v42, %v2054_v8  ;;  %v517_v48 = vmul.f32 %v2057_v17, %v2056_v45  ;;  %v2061_v38 = vld [vmem:[#allocation61_spill] sm:$0xff]  ;;  %v2065_v59 = vld [vmem:[#allocation63_spill] sm:$0xff]  ;;  %v2066_v31 = vld [vmem:[#allocation52_spill] sm:$0xff] }
  0xbc   :  { %v518_v13 = vmul.f32 %v2059_v51, %v2058_v63  ;;  %v519_v7 = vmul.f32 %v2061_v38, %v2060_v61  ;;  %v520_v33 = vmul.f32 %v2063_v6, %v2062_v26  ;;  %v521_v28 = vmul.f32 %v2065_v59, %v2064_v9  ;;  %v2067_v50 = vld [vmem:[#allocation64_spill] sm:$0xff]  ;;  %v2068_v20 = vld [vmem:[#allocation54_spill] sm:$0xff]  ;;  %v2069_v4 = vld [vmem:[#allocation65_spill] sm:$0xff] }
  0xbd   :  { %v522_v5 = vmul.f32 %v2067_v50, %v2066_v31  ;;  %v523_v54 = vmul.f32 %v2069_v4, %v2068_v20  ;;  %v2070_v21 = vld [vmem:[#allocation55_spill] sm:$0xff]  ;;  %v2071_v11 = vld [vmem:[#allocation66_spill] sm:$0xff]  ;;  %v2072_v53 = vld [vmem:[#allocation56_spill] sm:$0xff]  ;;  %v529_v17 = vadd.f32 %v513_v57, %v497_v34  ;;  %v530_v63 = vadd.f32 %v514_v60, %v498_v3 }
  0xbe   :  { %v524_v41 = vmul.f32 %v2071_v11, %v2070_v21  ;;  %v525_v18 = vmul.f32 %v1557_v46, %v2072_v53  ;;  %v2073_v36 = vld [vmem:[#allocation58_spill] sm:$0xff]  ;;  %v2074_v47 = vld [vmem:[#allocation59_spill] sm:$0xff]  ;;  %v2076_v8 = vld [vmem:[#allocation60_spill] sm:$0xff]  ;;  %v531_v51 = vadd.f32 %v515_v39, %v499_v12  ;;  %v532_v61 = vadd.f32 %v516_v35, %v500_v29 }
  0xbf   :  { %v526_v27 = vmul.f32 %v1563_v14, %v2073_v36  ;;  %v2075_v23 = vld [vmem:[#allocation67_spill] sm:$0xff]  ;;  %v2077_v42 = vld [vmem:[#allocation68_spill] sm:$0xff]  ;;  %v533_v38 = vadd.f32 %v517_v48, %v501_v19  ;;  %v534_v26 = vadd.f32 %v518_v13, %v502_v43  ;;  %v535_v6 = vadd.f32 %v519_v7, %v503_v62  ;;  %v2078_v11 = vld [vmem:[#allocation69_spill] sm:$0xff] }
  0xc0   :  { %v527_v15 = vmul.f32 %v2075_v23, %v2074_v47  ;;  %v528_v45 = vmul.f32 %v2077_v42, %v2076_v8  ;;  %v536_v9 = vadd.f32 %v520_v33, %v504_v37  ;;  %v537_v59 = vadd.f32 %v521_v28, %v505_v55  ;;  %v2079_v36 = vld [vmem:[#allocation70_spill] sm:$0xff]  ;;  %v2080_v34 = vld [vmem:[#allocation71_spill] sm:$0xff]  ;;  %v2081_v12 = vld [vmem:[#allocation72_spill] sm:$0xff] }
  0xc1   :  { %v538_v31 = vadd.f32 %v522_v5, %v506_v25  ;;  %v539_v46 = vadd.f32 %v523_v54, %v507_v30  ;;  %v540_v50 = vadd.f32 %v524_v41, %v508_v49  ;;  %v541_v20 = vadd.f32 %v525_v18, %v509_v16  ;;  %v2082_v19 = vld [vmem:[#allocation73_spill] sm:$0xff]  ;;  %v2083_v62 = vld [vmem:[#allocation74_spill] sm:$0xff]  ;;  %v2084_v55 = vld [vmem:[#allocation75_spill] sm:$0xff] }
  0xc2   :  { %v542_v14 = vadd.f32 %v526_v27, %v510_v44  ;;  %v543_v4 = vadd.f32 %v527_v15, %v511_v52  ;;  %v544_v21 = vadd.f32 %v528_v45, %v512_v2  ;;  %v545_v53 = vmul.f32 7.5, %v2078_v11  ;;  %v2085_v18 = vld [vmem:[#allocation3_spill] sm:$0xff] }
  0xc3   :  { %v546_v47 = vmul.f32 7.5, %v2079_v36  ;;  %v547_v3 = vmul.f32 7.5, %v2080_v34  ;;  %v548_v29 = vmul.f32 7.5, %v2081_v12  ;;  %v549_v43 = vmul.f32 7.5, %v2082_v19 }
  0xc4   :  { %v550_v37 = vmul.f32 7.5, %v2083_v62  ;;  %v551_v25 = vmul.f32 7.5, %v2084_v55  ;;  %v552_v30 = vmul.f32 7.5, %v1619_v40  ;;  %v553_v49 = vmul.f32 7.5, %v1621_v0 }
  0xc5   :  { %v554_v16 = vmul.f32 7.5, %v1623_v10  ;;  %v555_v44 = vmul.f32 7.5, %v1625_v24  ;;  %v556_v52 = vmul.f32 7.5, %v1635_v58  ;;  %v557_v2 = vmul.f32 7.5, %v1645_v32 }
  0xc6   :  { %v558_v57 = vmul.f32 7.5, %v1655_v1  ;;  %v559_v60 = vmul.f32 7.5, %v1665_v56  ;;  %v560_v39 = vmul.f32 7.5, %v1667_v22  ;;  %v561_v35 = vsub.f32 %v529_v17, %v545_v53 }
  0xc7   :  { %v562_v48 = vsub.f32 %v530_v63, %v546_v47  ;;  %v563_v13 = vsub.f32 %v531_v51, %v547_v3  ;;  %v564_v40 = vsub.f32 %v532_v61, %v548_v29  ;;  %v565_v7 = vsub.f32 %v533_v38, %v549_v43 }
  0xc8   :  { %v566_v0 = vsub.f32 %v534_v26, %v550_v37  ;;  %v567_v33 = vsub.f32 %v535_v6, %v551_v25  ;;  %v568_v10 = vsub.f32 %v536_v9, %v552_v30  ;;  %v569_v28 = vsub.f32 %v537_v59, %v553_v49 }
  0xc9   :  { %v570_v24 = vsub.f32 %v538_v31, %v554_v16  ;;  %v571_v5 = vsub.f32 %v539_v46, %v555_v44  ;;  %v572_v58 = vsub.f32 %v540_v50, %v556_v52  ;;  %v573_v54 = vsub.f32 %v541_v20, %v557_v2 }
  0xca   :  { %v574_v32 = vsub.f32 %v542_v14, %v558_v57  ;;  %v575_v41 = vsub.f32 %v543_v4, %v559_v60  ;;  %v576_v1 = vsub.f32 %v544_v21, %v560_v39  ;;  %v578_v56 = vmul.f32 %v561_v35, %v2085_v18 }
  0xcb   :  { %v579_v22 = vmul.f32 %v562_v48, %v2085_v18  ;;  %v580_v27 = vmul.f32 %v563_v13, %v2085_v18  ;;  %v581_v23 = vmul.f32 %v564_v40, %v2085_v18  ;;  %v582_v15 = vmul.f32 %v565_v7, %v2085_v18 }
  0xcc   :  { %v583_v8 = vmul.f32 %v566_v0, %v2085_v18  ;;  %v584_v42 = vmul.f32 %v567_v33, %v2085_v18  ;;  %v585_v45 = vmul.f32 %v568_v10, %v2085_v18  ;;  %v586_v17 = vmul.f32 %v569_v28, %v2085_v18  ;;  %595 = vst.msk [vmem:[%s1847_s2] sm:$0xff] %vm594_vm0, %v578_v56 }
  0xcd   :  { %v587_v63 = vmul.f32 %v570_v24, %v2085_v18  ;;  %v588_v51 = vmul.f32 %v571_v5, %v2085_v18  ;;  %v589_v61 = vmul.f32 %v572_v58, %v2085_v18  ;;  %v590_v38 = vmul.f32 %v573_v54, %v2085_v18  ;;  %596 = vst.msk [vmem:[%s1847_s2 + $0x8] sm:$0xff] %vm594_vm0, %v579_v22 }
  0xce   :  { %v591_v26 = vmul.f32 %v574_v32, %v2085_v18  ;;  %v592_v6 = vmul.f32 %v575_v41, %v2085_v18  ;;  %v593_v9 = vmul.f32 %v576_v1, %v2085_v18  ;;  %597 = vst.msk [vmem:[%s1847_s2 + $0x10] sm:$0xff] %vm594_vm0, %v580_v27  ;;  %598 = vst.msk [vmem:[%s1847_s2 + $0x18] sm:$0xff] %vm594_vm0, %v581_v23 }
  0xcf   :  { %599 = vst.msk [vmem:[%s1847_s2 + $0x20] sm:$0xff] %vm594_vm0, %v582_v15  ;;  %600 = vst.msk [vmem:[%s1847_s2 + $0x28] sm:$0xff] %vm594_vm0, %v583_v8 }
  0xd0   :  { %601 = vst.msk [vmem:[%s1847_s2 + $0x30] sm:$0xff] %vm594_vm0, %v584_v42  ;;  %602 = vst.msk [vmem:[%s1847_s2 + $0x38] sm:$0xff] %vm594_vm0, %v585_v45 }
  0xd1   :  { %603 = vst.msk [vmem:[%s1847_s2 + $0x40] sm:$0xff] %vm594_vm0, %v586_v17  ;;  %604 = vst.msk [vmem:[%s1847_s2 + $0x48] sm:$0xff] %vm594_vm0, %v587_v63 }
  0xd2   :  { %605 = vst.msk [vmem:[%s1847_s2 + $0x50] sm:$0xff] %vm594_vm0, %v588_v51  ;;  %606 = vst.msk [vmem:[%s1847_s2 + $0x58] sm:$0xff] %vm594_vm0, %v589_v61 }
  0xd3   :  { %607 = vst.msk [vmem:[%s1847_s2 + $0x60] sm:$0xff] %vm594_vm0, %v590_v38  ;;  %608 = vst.msk [vmem:[%s1847_s2 + $0x68] sm:$0xff] %vm594_vm0, %v591_v26 }
  0xd4   :  { %609 = vst.msk [vmem:[%s1847_s2 + $0x70] sm:$0xff] %vm594_vm0, %v592_v6  ;;  %610 = vst.msk [vmem:[%s1847_s2 + $0x78] sm:$0xff] %vm594_vm0, %v593_v9 }

</bundles_post_ra>
